<compile_context>
chip_gen: v5e
topology: v5e:2x2
jax: 0.10.0
libtpu: 0.0.40
codegen_flags: <defaults>
</compile_context>

<pallas_src>
import math

import jax
import jax.numpy as jnp
from jax import lax
from jax.experimental import pallas as pl
from jax.experimental.pallas import tpu as pltpu

EPS_F32 = float(jnp.finfo(jnp.float32).eps)   # torch.finfo(torch.float32).eps
EPS_F16 = float(jnp.finfo(jnp.float16).eps)   # torch.finfo(torch.float16).eps


def _em_step_kernel(f_ref, ft_ref, at_ref, wt_ref, lse_ref, mom_ref):
    """Fused EM step contractions for one tile of N rows.

    f_ref   : [tile_n, F]  features  F-columns = [x_i*x_j (D*D), x (D), 1]
    ft_ref  : [F, tile_n]  same features transposed (lane-dense in N)
    at_ref  : [K, F]       per-component coeffs [-0.5*vec(P_k), P_k mu_k, c_k]
    wt_ref  : [K, tile_n]  weighted log-likelihood (transposed) output
    lse_ref : [1, tile_n]  logsumexp over K output
    mom_ref : [K, F]       sum_n post[n,k] * F[n,:], accumulated over the grid:
                             [:, :D*D]       -> flattened second moments S_k
                             [:, D*D:D*D+D]  -> mu numerator
                             [:, -1]         -> unnormalized pi
    """
    i = pl.program_id(0)

    # ---- E-step: all K quadratic forms in a single MXU matmul -------------
    w_t = jnp.dot(at_ref[...], ft_ref[...],
                  preferred_element_type=jnp.float32)            # [K, tile_n]
    wt_ref[...] = w_t

    m = jnp.max(w_t, axis=0, keepdims=True)                      # [1, tile_n]
    lse = m + jnp.log(jnp.sum(jnp.exp(w_t - m), axis=0, keepdims=True))
    lse_ref[...] = lse

    post_t = jnp.exp(w_t - lse)                                  # [K, tile_n]

    # ---- M-step: pi, mu numerator and second moments in one MXU matmul ----
    part = jnp.dot(post_t, f_ref[...],
                   preferred_element_type=jnp.float32)           # [K, F]

    @pl.when(i == 0)
    def _():
        mom_ref[...] = part

    @pl.when(i > 0)
    def _():
        mom_ref[...] += part


def _pick_tile(n):
    # TILE must equal N or be a multiple of 128 that divides N (layout rules).
    if n <= 2048:
        return n
    for t in (2048, 1024, 512, 256, 128):
        if n % t == 0:
            return t
    return n


def _make_em_step(n, d, k):
    fdim = d * d + d + 1
    tile = _pick_tile(n)
    grid = (n // tile,)
    return pl.pallas_call(
        _em_step_kernel,
        grid=grid,
        in_specs=[
            pl.BlockSpec((tile, fdim), lambda i: (i, 0)),   # F
            pl.BlockSpec((fdim, tile), lambda i: (0, i)),   # F^T
            pl.BlockSpec((k, fdim), lambda i: (0, 0)),      # A^T (small, revisited)
        ],
        out_specs=(
            pl.BlockSpec((k, tile), lambda i: (0, i)),      # weighted^T
            pl.BlockSpec((1, tile), lambda i: (0, i)),      # logsumexp
            pl.BlockSpec((k, fdim), lambda i: (0, 0)),      # moments accumulator
        ),
        out_shape=(
            jax.ShapeDtypeStruct((k, n), jnp.float32),
            jax.ShapeDtypeStruct((1, n), jnp.float32),
            jax.ShapeDtypeStruct((k, fdim), jnp.float32),
        ),
        compiler_params=pltpu.CompilerParams(
            dimension_semantics=("arbitrary",),             # moments reduce over N-tiles
            vmem_limit_bytes=32 * 1024 * 1024,
        ),
    )


def loss_scale(loss, default_scale=100.0):
    return default_scale / jnp.abs(lax.stop_gradient(loss))


@jax.jit
def _em_loss_core(x, mu0):
    x = x.astype(jnp.float32)
    mu0 = mu0.astype(jnp.float32)
    n, d = x.shape
    k = mu0.shape[0]

    # Loop-invariant feature matrices (built once, reused every EM iteration).
    xx = (x[:, :, None] * x[:, None, :]).reshape(n, d * d)
    feats = jnp.concatenate([xx, x, jnp.ones((n, 1), jnp.float32)], axis=1)
    feats_t = feats.T

    em_step = _make_em_step(n, d, k)

    eps_eye = jnp.eye(d, dtype=jnp.float32) * EPS_F16
    cov0 = jnp.broadcast_to(jnp.eye(d, dtype=jnp.float32), (k, d, d)).astype(jnp.float32)
    pi0 = jnp.full((k,), 1.0 / k, dtype=jnp.float32)
    const_norm = -0.5 * d * math.log(2.0 * math.pi)

    def body(carry):
        it, _, mu, cov, pi, _, _ = carry

        # Glue with no clean Pallas primitive: batched inverse + slogdet.
        prec = jnp.linalg.inv(cov)                               # [K, D, D]
        prec = 0.5 * (prec + jnp.swapaxes(prec, -1, -2))         # symmetrize
        _, logdet = jnp.linalg.slogdet(cov)                      # [K]
        pmu = jnp.einsum("kij,kj->ki", prec, mu)                 # [K, D]
        mupmu = jnp.sum(pmu * mu, axis=1)                        # [K]
        c = -0.5 * logdet + const_norm + jnp.log(pi) - 0.5 * mupmu
        a_t = jnp.concatenate(
            [(-0.5 * prec).reshape(k, d * d), pmu, c[:, None]], axis=1)  # [K, F]

        w_t, lse, mom = em_step(feats, feats_t, a_t)

        s_flat = mom[:, : d * d]                                 # [K, D*D]
        num = mom[:, d * d: d * d + d]                           # [K, D]
        pi_col = mom[:, -1]                                      # [K]

        # if torch.any(pi == 0): pi = pi + eps   (eps added to every component)
        has_zero = jnp.any(pi_col == 0.0)
        pi_safe = pi_col + jnp.where(has_zero, EPS_F32, 0.0)

        mu_new = num / pi_safe[:, None]                          # [K, D]
        # Expanded centered covariance:
        #   sum post (x-mu)(x-mu)^T = S - num mu^T - mu num^T + pi_col mu mu^T
        outer = mu_new[:, :, None] * mu_new[:, None, :]
        coeff = 2.0 - pi_col / pi_safe
        cov_new = (s_flat.reshape(k, d, d) / pi_safe[:, None, None]
                   - coeff[:, None, None] * outer + eps_eye[None])
        pi_new = pi_safe / n

        allclose = (jnp.allclose(mu_new, mu)
                    & jnp.allclose(cov_new, cov)
                    & jnp.allclose(pi_new, pi))
        it_new = it + 1
        converged = allclose | (it_new > 10)
        return (it_new, converged, mu_new, cov_new, pi_new, w_t, lse)

    carry0 = (jnp.int32(0), jnp.array(False), mu0, cov0, pi0,
              jnp.zeros((k, n), jnp.float32), jnp.zeros((1, n), jnp.float32))
    _, _, mu_f, _, _, w_t_f, lse_f = lax.while_loop(
        lambda carry: jnp.logical_not(carry[1]), body, carry0)

    mean_lse = jnp.mean(lse_f)                                   # log_sum_lhood.mean()
    scale_multi = loss_scale(mean_lse, -50.0)
    _ = mean_lse * scale_multi      # 'loss' computed in the reference, not returned
    idx = jnp.argmax(w_t_f, axis=0)                              # [N]
    return -mean_lse, mean_lse, idx, mu_f


def em_loss_forward(x, mu, n_envs):
    """Reproduces em_loss(n_envs).forward(x, mu)."""
    assert x.ndim == 2 and mu.shape == (n_envs, x.shape[1])
    neg_mean_lse, mean_lse, idx, mu_f = _em_loss_core(x, mu)
    # F.one_hot default num_classes = max(idx) + 1 (data-dependent shape ->
    # host-side, matches the torch reference).  torch returns int64; int32 here.
    num_classes = int(jax.device_get(jnp.max(idx))) + 1
    split_all = jax.nn.one_hot(idx, num_classes, dtype=jnp.int32)
    return neg_mean_lse, float(mean_lse), split_all, mu_f


if __name__ == "__main__":
    key = jax.random.PRNGKey(0)
    N, D, n_envs = 64, 8, 4
    kx, kmu = jax.random.split(key)
    x = jax.random.normal(kx, (N, D), dtype=jnp.float32)
    mu0 = jax.random.normal(kmu, (n_envs, D), dtype=jnp.float32)

    neg_mean_lse, mean_lse_val, split_all, mu_final = em_loss_forward(x, mu0, n_envs)
    jax.block_until_ready((neg_mean_lse, split_all, mu_final))

    assert bool(jnp.isfinite(neg_mean_lse))
    assert split_all.shape[0] == N
    assert mu_final.shape == (n_envs, D)
    print("KERNEL_OK")
</pallas_src>

<mosaic_0001>
module attributes {stable_mosaic.version = 11 : i64} {
  func.func @_em_step_kernel(%arg0: i32, %arg1: memref<64x73xf32, #tpu.memory_space<vmem>>, %arg2: memref<73x64xf32, #tpu.memory_space<vmem>>, %arg3: memref<4x73xf32, #tpu.memory_space<vmem>>, %arg4: memref<4x64xf32, #tpu.memory_space<vmem>>, %arg5: memref<1x64xf32, #tpu.memory_space<vmem>>, %arg6: memref<4x73xf32, #tpu.memory_space<vmem>>) attributes {dimension_semantics = [#tpu.dimension_semantics<arbitrary>], iteration_bounds = array<i64: 1>, scalar_prefetch = 0 : i64, scratch_operands = 0 : i64, tpu.core_type = #tpu.core_type<tc>, window_params = [{transform_indices = @transform_0, window_bounds = array<i64: 64, 73>}, {transform_indices = @transform_1, window_bounds = array<i64: 73, 64>}, {pipeline_mode = #tpu.pipeline_mode<synchronous>, transform_indices = @transform_2, window_bounds = array<i64: 4, 73>}, {transform_indices = @transform_3, window_bounds = array<i64: 4, 64>}, {transform_indices = @transform_4, window_bounds = array<i64: 1, 64>}, {pipeline_mode = #tpu.pipeline_mode<synchronous>, transform_indices = @transform_5, window_bounds = array<i64: 4, 73>}]} {
    %c0 = arith.constant 0 : index
    %c0_0 = arith.constant 0 : index
    %0 = vector.load %arg3[%c0, %c0_0] : memref<4x73xf32, #tpu.memory_space<vmem>>, vector<4x73xf32>
    %c0_1 = arith.constant 0 : index
    %c0_2 = arith.constant 0 : index
    %1 = vector.load %arg2[%c0_1, %c0_2] : memref<73x64xf32, #tpu.memory_space<vmem>>, vector<73x64xf32>
    %cst = arith.constant dense<0.000000e+00> : vector<4x64xf32>
    %2 = tpu.matmul %0, %1, %cst {dimension_numbers = #tpu.dot_dimension_numbers<[1], [0], [0], [1], [0, 0, 1, 1], [], []>} : vector<4x73xf32>, vector<73x64xf32>, vector<4x64xf32> -> vector<4x64xf32>
    %c0_3 = arith.constant 0 : index
    %c0_4 = arith.constant 0 : index
    %3 = vector.load %arg4[%c0_3, %c0_4] : memref<4x64xf32, #tpu.memory_space<vmem>>, vector<4x64xf32>
    tpu.vector_store %arg4[%c0_3, %c0_4], %2 {strides = array<i32>} : memref<4x64xf32, #tpu.memory_space<vmem>>, vector<4x64xf32>,
    %cst_5 = arith.constant dense<0xFF800000> : vector<64xf32>
    %4 = vector.multi_reduction <maximumf>, %2, %cst_5 [0] : vector<4x64xf32> to vector<64xf32>
    %5 = vector.shape_cast %4 : vector<64xf32> to vector<1x64xf32>
    %6 = vector.broadcast %5 : vector<1x64xf32> to vector<4x64xf32>
    %7 = arith.subf %2, %6 : vector<4x64xf32>
    %8 = math.exp %7 : vector<4x64xf32>
    %cst_6 = arith.constant dense<0.000000e+00> : vector<64xf32>
    %9 = vector.multi_reduction <add>, %8, %cst_6 [0] : vector<4x64xf32> to vector<64xf32>
    %10 = vector.shape_cast %9 : vector<64xf32> to vector<1x64xf32>
    %11 = math.log %10 : vector<1x64xf32>
    %12 = arith.addf %5, %11 : vector<1x64xf32>
    %c0_7 = arith.constant 0 : index
    %c0_8 = arith.constant 0 : index
    %13 = vector.load %arg5[%c0_7, %c0_8] : memref<1x64xf32, #tpu.memory_space<vmem>>, vector<1x64xf32>
    tpu.vector_store %arg5[%c0_7, %c0_8], %12 {strides = array<i32>} : memref<1x64xf32, #tpu.memory_space<vmem>>, vector<1x64xf32>,
    %14 = vector.broadcast %12 : vector<1x64xf32> to vector<4x64xf32>
    %15 = arith.subf %2, %14 : vector<4x64xf32>
    %16 = math.exp %15 : vector<4x64xf32>
    %c0_9 = arith.constant 0 : index
    %c0_10 = arith.constant 0 : index
    %17 = vector.load %arg1[%c0_9, %c0_10] : memref<64x73xf32, #tpu.memory_space<vmem>>, vector<64x73xf32>
    %cst_11 = arith.constant dense<0.000000e+00> : vector<4x73xf32>
    %18 = tpu.matmul %16, %17, %cst_11 {dimension_numbers = #tpu.dot_dimension_numbers<[1], [0], [0], [1], [0, 0, 1, 1], [], []>} : vector<4x64xf32>, vector<64x73xf32>, vector<4x73xf32> -> vector<4x73xf32>
    %c0_i32 = arith.constant 0 : i32
    %19 = arith.cmpi eq, %arg0, %c0_i32 : i32
    %20 = arith.extui %19 : i1 to i32
    %c0_i32_12 = arith.constant 0 : i32
    %21 = arith.cmpi ne, %20, %c0_i32_12 : i32
    scf.if %21 {
      %c0_15 = arith.constant 0 : index
      %c0_16 = arith.constant 0 : index
      %25 = vector.load %arg6[%c0_15, %c0_16] : memref<4x73xf32, #tpu.memory_space<vmem>>, vector<4x73xf32>
      tpu.vector_store %arg6[%c0_15, %c0_16], %18 {strides = array<i32>} : memref<4x73xf32, #tpu.memory_space<vmem>>, vector<4x73xf32>,
    } else {
    }
    %c0_i32_13 = arith.constant 0 : i32
    %22 = arith.cmpi sgt, %arg0, %c0_i32_13 : i32
    %23 = arith.extui %22 : i1 to i32
    %c0_i32_14 = arith.constant 0 : i32
    %24 = arith.cmpi ne, %23, %c0_i32_14 : i32
    scf.if %24 {
      %c0_15 = arith.constant 0 : index
      %c0_16 = arith.constant 0 : index
      %25 = vector.load %arg6[%c0_15, %c0_16] : memref<4x73xf32, #tpu.memory_space<vmem>>, vector<4x73xf32>
      %26 = arith.addf %25, %18 : vector<4x73xf32>
      %c0_17 = arith.constant 0 : index
      %c0_18 = arith.constant 0 : index
      %27 = vector.load %arg6[%c0_17, %c0_18] : memref<4x73xf32, #tpu.memory_space<vmem>>, vector<4x73xf32>
      tpu.vector_store %arg6[%c0_17, %c0_18], %26 {strides = array<i32>} : memref<4x73xf32, #tpu.memory_space<vmem>>, vector<4x73xf32>,
    } else {
    }
    return
  }
  func.func @transform_0(%arg0: i32) -> (i32, i32) {
    %c0_i32 = arith.constant 0 : i32
    %c0_i32_0 = arith.constant 0 : i32
    return %arg0, %c0_i32 : i32, i32
  }
  func.func @transform_1(%arg0: i32) -> (i32, i32) {
    %c0_i32 = arith.constant 0 : i32
    %c0_i32_0 = arith.constant 0 : i32
    return %c0_i32, %arg0 : i32, i32
  }
  func.func @transform_2(%arg0: i32) -> (i32, i32) {
    %c0_i32 = arith.constant 0 : i32
    %c0_i32_0 = arith.constant 0 : i32
    %c0_i32_1 = arith.constant 0 : i32
    return %c0_i32, %c0_i32_0 : i32, i32
  }
  func.func @transform_3(%arg0: i32) -> (i32, i32) {
    %c0_i32 = arith.constant 0 : i32
    %c0_i32_0 = arith.constant 0 : i32
    return %c0_i32, %arg0 : i32, i32
  }
  func.func @transform_4(%arg0: i32) -> (i32, i32) {
    %c0_i32 = arith.constant 0 : i32
    %c0_i32_0 = arith.constant 0 : i32
    return %c0_i32, %arg0 : i32, i32
  }
  func.func @transform_5(%arg0: i32) -> (i32, i32) {
    %c0_i32 = arith.constant 0 : i32
    %c0_i32_0 = arith.constant 0 : i32
    %c0_i32_1 = arith.constant 0 : i32
    return %c0_i32, %c0_i32_0 : i32, i32
  }
}

</mosaic_0001>

<bundles_post_ra>
// kernel: custom-call.38
= control target key start
LH: loop header
LB: loop body
LE: loop exit
PB: predicated region body
PF: predicated region fallthrough
CT: control target
= control target key end

     0   :  { %5 = vsyncpa [#allocation4], 0  ;;  %s898_s0 = inlined_call_operand.vmem [shape: f32[4,8,8], index: 0, kind: input, shape index: {}]   ;;  %s899_s1 = inlined_call_operand.vmem [shape: f32[4,8,8], index: 1, kind: output, shape index: {0}]   ;;  %s900_s2 = inlined_call_operand.hbm [shape: s32[4,8], index: 2, kind: output, shape index: {1}]   ;;  %s901_s3 = inlined_call_operand.vmem [shape: s32[4,8], index: 3, kind: output, shape index: {2}]  }
   0x1   :  { %7 = vsyncpa [#allocation4 + $0x1], 0  ;;  %s725_s12 = smov 0   ;;  %s727_s13 = smov 0  }
   0x2   :  { %s729_s14 = smov 0   ;;  %s731_s15 = smov 0  }
   0x3 LB: > { %s746_s16 = sadd.s32 4294967295, %s698_s15   ;;  %s561_s17 = sadd.s32 4294967294, %s698_s15   ;;  %s698_s15 = sphi %s731_s15, %s907_s15   ;;  %s694_s14 = sphi %s729_s14, %s906_s14   ;;  %s690_s13 = sphi %s727_s13, %s905_s13   ;;  %s686_s12 = sphi %s725_s12, %s904_s12  }
   0x4   : > { %s750_s18 = sadd.s32 1, %s698_s15   ;;  %s17_s19 = sshrl.u32 %s698_s15, 3 }
   0x5   : > { %s18_s20 = sshrl.u32 %s750_s18, 3  ;;  %s22_s21 = sadd.s32 1, %s694_s14 }
   0x6   : > { %s19_s22 = ssub.s32 %s17_s19, %s18_s20  ;;  %p32_p0 = scmp.ne.s32.totalorder %s694_s14, %s690_s13 }
   0x7   : > { %p20_p1 = scmp.eq.s32.totalorder %s19_s22, 0  ;;  %p33_p2 = scmp.eq.s32.totalorder %s746_s16, 3 }
   0x8   : > { %p38_p3 = scmp.ne.s32.totalorder %s690_s13, %s686_s12  ;;  %p39_p4 = scmp.eq.s32.totalorder %s561_s17, 3 }
   0x9   : > { %s761_s23 = scalar_select %p20_p1, %s694_s14, %s22_s21  }
   0xa   : > { %p763_p5 = por %p33_p2, %p32_p0  ;;  %p767_p6 = por %p39_p4, %p38_p3 }
   0xb   : > { %p563_p7 = scmp.ge.s32.totalorder %s698_s15, 4 }
   0xc   : > { %s85_s26 = sand.u32 (!%p563_p7), 1, %s698_s15   ;;  %s565_s27 = sshll.u32 (!%p563_p7), %s698_s15, 3 }
   0xd   : > { %83 = sbr.rel (%p563_p7) target bundleno = 20 (0x14), region = 16  ;;  %s564_s28 = sshll.u32 (!%p563_p7), %s85_s26, 3 }
   0xe   : > { %s89_s4 = scalar_lea.vmem (!%p563_p7), %s898_s0, %s565_s27  ;;  %s87_s5 = scalar_lea.vmem (!%p563_p7), [#allocation0], %s564_s28 }
  0x12   : > { %v118_v0 = vld [vmem:[%s89_s4] sm:$0xff] }
  0x13   : > { %119 = vst [vmem:[%s87_s5] sm:$0xff] %v118_v0 }
  0x14 PF: > { %p566_p8 = scmp.ge.s32.totalorder %s698_s15, 1  ;;  %p124_p9 = scmp.lt.s32.totalorder %s698_s15, 5 }
  0x16   : > { %p125_p10 = pnand %p566_p8, %p124_p9 }
  0x18   : > { %128 = sbr.rel (%p125_p10) target bundleno = 476 (0x1dc), region = 54 }
  0x1d   : > { %s131_s6 = sand.u32 1, %s746_s16   ;;  %s146_s7 = sand.u32 1, %s690_s13   ;;  %v164_v1 = vlaneseq  ;;  %v704_v4 = vmov 0  }
  0x1e   : > { %s567_s8 = sshll.u32 %s131_s6, 3  ;;  %s783_s9 = sshll.u32 %s146_s7, 2 }
  0x1f   : > { %v786_v2 = vshrl.u32 %v164_v1, 7  ;;  %s133_s10 = scalar_lea.vmem [#allocation0], %s567_s8  ;;  %s788_s11 = scalar_lea.vmem [#allocation1], %s567_s8 }
  0x20   : > { %v157_v3 = vld [vmem:[%s133_s10] sm:$0xff]  ;;  %s159_s17 = sand.u32 7, %s746_s16   ;;  %s148_s20 = scalar_lea.vmem [#allocation3], %s783_s9 }
  0x21   : > { %158 = vst [vmem:[%s788_s11] sm:$0xff] %v157_v3  ;;  %s793_s19 = scalar_lea.vmem [#allocation2], %s159_s17  ;;  %s154_s21 = scalar_lea.vmem [#allocation6], %s783_s9 }
  0x22   : > { %168 = vst [vmem:[#allocation7] sm:$0xff] %v786_v2  ;;  %s798_s22 = scalar_lea.vmem [#allocation5], %s159_s17  ;;  %s800_s26 = smov 0  }
  0x23   : > { %163 = vst [vmem:[%s793_s19] sm:$0x1] %v704_v4 }
  0x24 LB: >> { %v807_v7 = vstv %s702_s26  ;;  %s225_s27 = ssub.s32 128, %s702_s26  ;;  %s237_s28 = scalar_lea.vmem %s788_s11, %s702_s26 [#allocation1]  ;;  %v231_v38 = vand.u32 127, %v164_v1  ;;  %s702_s26 = sphi %s800_s26, %s174_s26  }
  0x25   : >> { %vm183_vm0 = vcmp.ge.s32.totalorder %v786_v2, %v807_v7  ;;  %s243_s4 = scalar_lea.vmem [#allocation7], %s702_s26  ;;  %vm263_vm12 = vcmp.gt.s32.totalorder %v786_v2, %v807_v7  ;;  %s174_s26 = sadd.s32 1, %s702_s26  }
  0x26   : >> { %vm232_vm10 = vcmp.eq.s32.totalorder %v231_v38, %v807_v7  ;;  %p171_p11 = scmp.ge.s32.totalorder %s174_s26, 8  }
  0x27   : > { %s399_s6 = sshrl.u32 (%p171_p11), %s746_s16, 3  ;;  %s405_s26 = sshll.u32 (%p171_p11), %s148_s20, 4  ;;  %s406_s26 = int_to_ptr.vmem [resolvable:$true] %s405_s26 }
  0x28   : >> { %v179_v5 = vld [vmem:[%s788_s11] sm:$0xff]  ;;  %v239_v39 = vld [vmem:[%s237_s28] ss:$0 sm:$0xff]  ;;  %s843_s8 = sshll.u32 (%p171_p11), %s399_s6, 2 }
  0x29   : >> { %v180_v6 = vand.u32 2147483647, %v179_v5  ;;  %v245_v43 = vld [vmem:[%s243_s4] ss:$0 sm:$0xff] }
  0x2a   : >> { %v234_v41 = vld [vmem:[%s793_s19] ss:$0 sm:$0xff] }
  0x2b   : >> { %vm571_vm1 = vcmp.gt.f32.partialorder %v180_v6, -inf }
  0x2c   : >> { %vm187_vm2 = vmand %vm183_vm0, %vm571_vm1 }
  0x2d   : >> { %v188_v8 = vsel %vm187_vm2, %v786_v2, %v807_v7  ;;  %v189_v9 = vsel %vm187_vm2, %v180_v6, -inf  ;;  %vm280_vm2 = vmand %vm263_vm12, %vm232_vm10 }
  0x2e   : >> { %v190_v10 = vrot.slane %v189_v9, 1  ;;  %v191_v11 = vrot.slane %v188_v8, 1 }
  0x30   : >> { %vm192_vm3 = vcmp.ge.f32.partialorder %v190_v10, %v189_v9  ;;  %v195_v12 = vrot.slane %v190_v10, 1  ;;  %v196_v13 = vrot.slane %v191_v11, 1 }
  0x31   : >> { %v193_v14 = vsel %vm192_vm3, %v190_v10, %v189_v9  ;;  %v194_v15 = vsel %vm192_vm3, %v191_v11, %v188_v8  ;;  %vm255_vm3 = vcmp.gt.s32.totalorder %v231_v38, %v807_v7 }
  0x32   : >> { %vm197_vm4 = vcmp.ge.f32.partialorder %v195_v12, %v193_v14  ;;  %v200_v16 = vrot.slane %v195_v12, 1  ;;  %v201_v17 = vrot.slane %v196_v13, 1 }
  0x33   : >> { %v198_v18 = vsel %vm197_vm4, %v195_v12, %v193_v14  ;;  %v199_v19 = vsel %vm197_vm4, %v196_v13, %v194_v15 }
  0x34   : >> { %vm202_vm5 = vcmp.ge.f32.partialorder %v200_v16, %v198_v18  ;;  %v205_v20 = vrot.slane %v200_v16, 1  ;;  %v206_v21 = vrot.slane %v201_v17, 1 }
  0x35   : >> { %v203_v22 = vsel %vm202_vm5, %v200_v16, %v198_v18  ;;  %v204_v23 = vsel %vm202_vm5, %v201_v17, %v199_v19 }
  0x36   : >> { %vm207_vm6 = vcmp.ge.f32.partialorder %v205_v20, %v203_v22  ;;  %v210_v24 = vrot.slane %v205_v20, 1  ;;  %v211_v25 = vrot.slane %v206_v21, 1 }
  0x37   : >> { %v208_v26 = vsel %vm207_vm6, %v205_v20, %v203_v22  ;;  %v209_v27 = vsel %vm207_vm6, %v206_v21, %v204_v23 }
  0x38   : >> { %vm212_vm7 = vcmp.ge.f32.partialorder %v210_v24, %v208_v26  ;;  %v215_v28 = vrot.slane %v210_v24, 1  ;;  %v216_v29 = vrot.slane %v211_v25, 1 }
  0x39   : >> { %v213_v30 = vsel %vm212_vm7, %v210_v24, %v208_v26  ;;  %v214_v31 = vsel %vm212_vm7, %v211_v25, %v209_v27 }
  0x3a   : >> { %vm217_vm8 = vcmp.ge.f32.partialorder %v215_v28, %v213_v30  ;;  %v220_v32 = vrot.slane %v215_v28, 1  ;;  %v221_v33 = vrot.slane %v216_v29, 1 }
  0x3b   : >> { %v218_v34 = vsel %vm217_vm8, %v215_v28, %v213_v30  ;;  %v219_v35 = vsel %vm217_vm8, %v216_v29, %v214_v31 }
  0x3c   : >> { %vm222_vm9 = vcmp.ge.f32.partialorder %v220_v32, %v218_v34 }
  0x3d   : >> { %v224_v36 = vsel %vm222_vm9, %v221_v33, %v219_v35 }
  0x3e   : >> { %226 = vrot.lane.b32.xlu0 %v224_v36, %s225_s27  ;;  %s403_s27 = scalar_lea.hbm (%p171_p11), %s900_s2, %s843_s8 }
  0xb0   : >> { %v227_v37 = vpop.permute.xlu0 %226 }
  0xb1   : >> { %580 = vpush %v227_v37 }
  0xe2   : >> { %s581_s29 = spop %580 }
  0xe3   : >> { %v233_v40 = vstv %s581_s29  ;;  %s238_s30 = scalar_lea.vmem %s788_s11, %s581_s29 [#allocation1]  ;;  %s244_s5 = scalar_lea.vmem [#allocation7], %s581_s29 }
  0xe4   : >> { %v240_v42 = vld [vmem:[%s238_s30] ss:$0 sm:$0xff]  ;;  %v235_v45 = vsel %vm232_vm10, %v233_v40, %v234_v41 }
  0xe5   : >> { %v246_v44 = vld [vmem:[%s244_s5] ss:$0 sm:$0xff]  ;;  %241 = vst [vmem:[%s238_s30] sm:$0x1] %v239_v39  ;;  %vm249_vm11 = vcmp.ne.f32.partialorder %v240_v42, 0.0  ;;  %v256_v61 = vsel %vm255_vm3, %v240_v42, 0.0 }
  0xe6   : >> { %242 = vst [vmem:[%s237_s28] sm:$0x1] %v240_v42  ;;  %vm250_vm13 = vmand %vm232_vm10, %vm249_vm11  ;;  %s575_s28 = sshll.u32 (%p171_p11), %s746_s16, 3 }
  0xe7   : >> { %247 = vst [vmem:[%s244_s5] sm:$0x1] %v245_v43  ;;  %v251_v46 = vsel %vm250_vm13, %v240_v42, 1.0  ;;  %s353_s5 = scalar_lea.sflag (%p171_p11), [#allocation4], %s146_s7 }
  0xe8   : >> { %248 = vst [vmem:[%s243_s4] sm:$0x1] %v246_v44  ;;  %v264_v47 = vsel %vm263_vm12, %v251_v46, 1.0  ;;  %s362_s4 = scalar_lea.vmem (%p171_p11), %s899_s1, %s575_s28 }
  0xe9   : >> { %630 = vrcp.f32 %v264_v47  ;;  %236 = vst [vmem:[%s793_s19] sm:$0x1] %v235_v45  ;;  %v276_v51 = vand.u32 2147483648, %v264_v47  ;;  %v274_v53 = vand.u32 2147483647, %v264_v47  ;;  %vm270_vm15 = vweird.f32 %v264_v47  ;;  %s407_s19 = sshll.u32 (%p171_p11), %s403_s27, 4  ;;  %s652_s27 = scalar_lea.hbm (%p171_p11), %s900_s2, 4  ;;  %s408_s19 = int_to_ptr.hbm [resolvable:$true] %s407_s19 }
  0xea   : > { %s646_s6 = sshra.s32 (%p171_p11), %s408_s19, 4  ;;  %s647_s6 = int_to_ptr.hbm [resolvable:$true] %s646_s6 }
  0xeb   : >> { %v277_v55 = vor.u32 1.1754944e-38, %v276_v51  ;;  %vm275_vm1 = vcmp.eq.f32.partialorder %v274_v53, 8.507059e+37  ;;  %s648_s10 = scalar_lea.hbm (%p171_p11), %s647_s6, 4  ;;  %p653_p1 = scmp.lt.s32.totalorder (%p171_p11), %s647_s6, %s900_s2 }
  0xec   : > { %p649_p12 = scmp.ne.s32.totalorder (%p171_p11), %s647_s6, %s648_s10  ;;  %p654_p2 = scmp.lt.s32.totalorder (%p171_p11), %s652_s27, %s648_s10 }
  0xed   : >> { %v260_v57 = vld [vmem:[%s788_s11] sm:$0xff] }
  0xee   : > { %p650_p13 = pnand (%p171_p11), %p649_p12, %p763_p5  ;;  %p655_p3 = por (%p171_p11), %p654_p2, %p653_p1 }
  0xef   : >> { %v631_v48 = vpop.eup %630  ;;  %v287_v3 = vld [vmem:[#allocation7] sm:$0xff] (%p171_p11) }
  0xf0   : >> { %v266_v49 = vmul.f32 %v631_v48, %v264_v47  ;;  %vm271_vm14 = vweird.f32 %v631_v48  ;;  %v338_v1 = vld [vmem:[#allocation2] sm:$0xf] (%p171_p11)  ;;  %p651_p0 = pneg (%p171_p11), %p650_p13 }
  0xf1   : >> { %vm272_vm0 = vmor %vm270_vm15, %vm271_vm14  ;;  %341 = vst [vmem:[%s148_s20] sm:$0xf] (%p171_p11), %v338_v1 }
  0xf2   : >> { %v267_v50 = vsub.f32 1.0, %v266_v49  ;;  %p656_p4 = pnand (%p171_p11), %p655_p3, %p651_p0 }
  0xf4   : >> { %v268_v52 = vmul.f32 %v631_v48, %v267_v50 }
  0xf6   : >> { %v269_v54 = vadd.f32 %v631_v48, %v268_v52 }
  0xf8   : >> { %v273_v56 = vsel %vm272_vm0, %v631_v48, %v269_v54 }
  0xf9   : >> { %v278_v58 = vsel %vm275_vm1, %v277_v55, %v273_v56 }
  0xfa   : >> { %v279_v59 = vmul.f32 %v278_v58, %v260_v57 }
  0xfc   : >> { %v281_v60 = vsel %vm280_vm2, %v279_v59, 0.0 }
  0xfd   : >> { %282 = vadd.xlane.f32.xlu0 %v281_v60 }
 0x126   : > { %303 = vxpose.xlu0.b32.start.end [1/1] (short) (narrow) (%p171_p11), %v287_v3, 8 }
 0x170   : >> { %v283_v62 = vpop.xlane.xlu0 %282 }
 0x171   : >> { %v284_v63 = vmul.f32 %v283_v62, %v256_v61  ;;  %173 = sbr.rel (!%p171_p11) target bundleno = 36 (0x24), region = 210 }
 0x173   : >> { %v285_v0 = vsub.f32 %v279_v59, %v284_v63 }
 0x175   : >> { %286 = vst [vmem:[%s788_s11] sm:$0xff] %v285_v0 }
 0x17c   : > { %v391_v2 = vld [vmem:[%s788_s11] sm:$0xff] }
 0x17d   : > { %392 = vst [vmem:[%s362_s4] sm:$0xff] %v391_v2 }
 0x17e   : > { %659 = shalt.err (!%p656_p4)
}
 0x17f   : > { %582 = dma.vmem_to_hbm [thread:$0]  (%p763_p5), %s406_s26, 64, %s408_s19, %s353_s5  }
 0x180   : > { %s416_s20 = scalar_lea.vmem (%p763_p5), %s901_s3, %s843_s8 }
 0x1ca   : > { %v319_v4 = vpop.trf.xlu0 }
 0x1cb   : > { %335 = vst [vmem:[%s798_s22] sm:$0x1] %v319_v4 }
 0x1cf   : > { %413 = sbr.rel (!%p763_p5) target bundleno = 476 (0x1dc), region = 104 }
 0x1d2   : > { %v344_v5 = vld [vmem:[#allocation5] sm:$0xf] }
 0x1d3   : > { %347 = vst [vmem:[%s154_s21] sm:$0xf] %v344_v5 }
 0x1da   : > { %v433_v6 = vld [vmem:[%s154_s21] sm:$0xf] }
 0x1db   : > { %434 = vst [vmem:[%s416_s20] sm:$0xf] %v433_v6 }
 0x1dc PF: > { %p588_p7 = scmp.ge.s32.totalorder %s698_s15, 2  ;;  %s462_s22 = sand.u32 1, %s686_s12  }
 0x1dd   : > { %s463_s24 = scalar_lea.sflag [#allocation4], %s462_s22 }
 0x1de   : > { %p585_p8 = pnand %p588_p7, %p767_p6 }
 0x1e0   : > { %p586_p9 = pneg %p585_p8 }
 0x1e2   : > { %681 = dma.done.wait (%p586_p9), %s463_s24, 64  }
 0x1e3   : > { %683 = vsyncadd (%p586_p9), %s463_s24, 4294967232  ;;  %p10_p5 = scmp.ge.s32.totalorder %s750_s18, 6   ;;  %s904_s12 = smov %s690_s13 }
 0x1e4   : > { %s905_s13 = smov %s694_s14  ;;  %s906_s14 = smov %s761_s23 }
 0x1e5   : > { %s907_s15 = smov %s750_s18  ;;  %12 = sbr.rel (!%p10_p5) target bundleno = 3 (0x3), region = 221 }
 0x1ea   :  { %476 = vsyncpa [#allocation4], 1 }
 0x1eb   :  { %478 = vsyncpa [#allocation4 + $0x1], 1 }

// kernel: custom-call.39
= control target key start
LH: loop header
LB: loop body
LE: loop exit
PB: predicated region body
PF: predicated region fallthrough
CT: control target
= control target key end

     0   :  { %s413_s6 = smov 0   ;;  %s415_s7 = smov 0   ;;  %s478_s0 = inlined_call_operand.vmem [shape: f32[4,1,8,8], index: 0, kind: input, shape index: {}]   ;;  %s479_s1 = inlined_call_operand.vmem [shape: f32[4,1,8,8], index: 1, kind: output, shape index: {}]  }
   0x1   :  { %s417_s8 = smov 0  }
   0x2 LB: > { %s339_s9 = sadd.s32 4294967295, %s400_s8   ;;  %s33_s10 = sadd.s32 1, %s396_s7  ;;  %s400_s8 = sphi %s417_s8, %s7_s8   ;;  %s396_s7 = sphi %s415_s7, %s481_s7   ;;  %s392_s6 = sphi %s413_s6, %s480_s6  }
   0x3   : > { %p35_p0 = scmp.ge.s32.totalorder %s33_s10, 4  ;;  %p341_p1 = scmp.ge.s32.totalorder %s400_s8, 4 }
   0x4   : > { %s49_s11 = sand.u32 (!%p341_p1), 1, %s400_s8   ;;  %s343_s12 = sshll.u32 (!%p341_p1), %s396_s7, 3 }
   0x5   : > { %s483_s10 = smov (%p35_p0, %s33_s10), 0  ;;  %47 = sbr.rel (%p341_p1) target bundleno = 12 (0xc), region = 16 }
   0x6   : > { %s342_s13 = sshll.u32 (!%p341_p1), %s49_s11, 3  ;;  %s56_s16 = scalar_lea.vmem (!%p341_p1), %s478_s0, %s343_s12 }
   0x7   : > { %s51_s17 = scalar_lea.vmem (!%p341_p1), [#allocation0], %s342_s13 }
   0xa   : > { %v85_v0 = vld [vmem:[%s56_s16] sm:$0xff] }
   0xb   : > { %86 = vst [vmem:[%s51_s17] sm:$0xff] %v85_v0 }
   0xc PF: > { %p344_p2 = scmp.ge.s32.totalorder %s400_s8, 1  ;;  %p91_p3 = scmp.lt.s32.totalorder %s400_s8, 5 }
   0xe   : > { %p92_p4 = pnand %p344_p2, %p91_p3 }
  0x10   : > { %95 = sbr.rel (%p92_p4) target bundleno = 1009 (0x3f1), region = 54 }
  0x15   : > { %s98_s18 = sand.u32 1, %s339_s9   ;;  %v109_v1 = vlaneseq  ;;  %v402_v19 = vmov -1.0   ;;  %s348_s21 = sshll.u32 %s392_s6, 3 }
  0x16   : > { %s345_s19 = sshll.u32 %s98_s18, 3  ;;  %s246_s24 = scalar_lea.vmem %s479_s1, %s348_s21 }
  0x17   : > { %v440_v2 = vand.u32 127, %v109_v1  ;;  %v113_v3 = vshrl.u32 %v109_v1, 7  ;;  %s100_s20 = scalar_lea.vmem [#allocation0], %s345_s19 }
  0x18   : > { %v116_v4 = vld [vmem:[%s100_s20] sm:$0xff] }
  0x19   : > { %vm115_vm0 = vcmp.eq.s32.totalorder %v113_v3, %v440_v2  ;;  %vm111_vm1 = vcmp.lt.s32.totalorder %v440_v2, 8  ;;  %vm120_vm2 = vcmp.ge.s32.totalorder %v113_v3, %v440_v2  ;;  %vm147_vm8 = vcmp.eq.s32.totalorder %v440_v2, 0 }
  0x1a   : > { %v117_v5 = vsel %vm115_vm0, %v116_v4, 0.0  ;;  %vm121_vm3 = vmand %vm120_vm2, %vm111_vm1  ;;  %vm144_vm9 = vcmp.eq.s32.totalorder %v440_v2, %v113_v3  ;;  %v148_v20 = vsel %vm147_vm8, 1.0, %v402_v19  ;;  %vm155_vm10 = vcmp.eq.s32.totalorder %v440_v2, 1 }
  0x1b   : > { %118 = vadd.xlane.f32.xlu0 %v117_v5  ;;  %v122_v14 = vsel %vm121_vm3, %v116_v4, 0.0  ;;  %v149_v21 = vsel %vm144_vm9, %v148_v20, 0.0  ;;  %vm165_vm11 = vcmp.eq.s32.totalorder %v440_v2, 2  ;;  %vm175_vm12 = vcmp.eq.s32.totalorder %v440_v2, 3 }
  0x1c   : > { %vm185_vm13 = vcmp.eq.s32.totalorder %v440_v2, 4  ;;  %vm195_vm14 = vcmp.eq.s32.totalorder %v440_v2, 5  ;;  %vm205_vm15 = vcmp.eq.s32.totalorder %v440_v2, 6  ;;  %vm215_vm0 = vcmp.eq.s32.totalorder %v440_v2, 7 }
  0x8e   : > { %v443_v6 = vpop.xlane.xlu0 %118 }
  0x8f   : > { %376 = vrcp.f32 %v443_v6  ;;  %v134_v10 = vand.u32 2147483648, %v443_v6  ;;  %v132_v12 = vand.u32 2147483647, %v443_v6  ;;  %vm128_vm5 = vweird.f32 %v443_v6 }
  0x91   : > { %v135_v15 = vor.u32 1.1754944e-38, %v134_v10  ;;  %vm133_vm7 = vcmp.eq.f32.partialorder %v132_v12, 8.507059e+37 }
  0x95   : > { %v377_v7 = vpop.eup %376 }
  0x96   : > { %v124_v8 = vmul.f32 %v377_v7, %v443_v6  ;;  %vm129_vm4 = vweird.f32 %v377_v7 }
  0x97   : > { %vm130_vm6 = vmor %vm128_vm5, %vm129_vm4 }
  0x98   : > { %v125_v9 = vsub.f32 1.0, %v124_v8 }
  0x9a   : > { %v126_v11 = vmul.f32 %v377_v7, %v125_v9 }
  0x9c   : > { %v127_v13 = vadd.f32 %v377_v7, %v126_v11 }
  0x9e   : > { %v131_v16 = vsel %vm130_vm6, %v377_v7, %v127_v13 }
  0x9f   : > { %v136_v17 = vsel %vm133_vm7, %v135_v15, %v131_v16 }
  0xa0   : > { %v137_v18 = vmul.f32 %v136_v17, %v122_v14 }
  0xa2   : > { %138 = vst [vmem:[#allocation2] sm:$0xff] %v137_v18 }
  0xa9   : > { %v151_v22 = vld [vmem:[#allocation2 + $0x1] ss:$0 sm:$0xff]  ;;  %v161_v25 = vld [vmem:[#allocation2 + $0x2] ss:$0 sm:$0xff]  ;;  %v171_v30 = vld [vmem:[#allocation2 + $0x3] ss:$0 sm:$0xff] }
  0xaa   : > { %v152_v23 = vxor.u32 2147483648, %v151_v22  ;;  %v162_v27 = vxor.u32 2147483648, %v161_v25  ;;  %v172_v32 = vxor.u32 2147483648, %v171_v30  ;;  %v181_v35 = vld [vmem:[#allocation2 + $0x4] ss:$0 sm:$0xff] }
  0xab   : > { %v182_v37 = vxor.u32 2147483648, %v181_v35  ;;  %v191_v40 = vld [vmem:[#allocation2 + $0x5] ss:$0 sm:$0xff]  ;;  %v201_v45 = vld [vmem:[#allocation2 + $0x6] ss:$0 sm:$0xff] }
  0xac   : > { %v156_v24 = vmul.f32 %v152_v23, %v149_v21  ;;  %v192_v42 = vxor.u32 2147483648, %v191_v40  ;;  %v202_v47 = vxor.u32 2147483648, %v201_v45  ;;  %v211_v50 = vld [vmem:[#allocation2 + $0x7] ss:$0 sm:$0xff] }
  0xad   : > { %v212_v52 = vxor.u32 2147483648, %v211_v50 }
  0xae   : > { %157 = vadd.xlane.f32.xlu0 %v156_v24 }
 0x121   : > { %v158_v26 = vpop.xlane.xlu0 %157 }
 0x122   : > { %v159_v28 = vsel %vm155_vm10, %v158_v26, %v149_v21 }
 0x123   : > { %v166_v29 = vmul.f32 %v162_v27, %v159_v28 }
 0x125   : > { %167 = vadd.xlane.f32.xlu1 %v166_v29 }
 0x198   : > { %v168_v31 = vpop.xlane.xlu1 %167 }
 0x199   : > { %v169_v33 = vsel %vm165_vm11, %v168_v31, %v159_v28 }
 0x19a   : > { %v176_v34 = vmul.f32 %v172_v32, %v169_v33 }
 0x19c   : > { %177 = vadd.xlane.f32.xlu1 %v176_v34 }
 0x20f   : > { %v178_v36 = vpop.xlane.xlu1 %177 }
 0x210   : > { %v179_v38 = vsel %vm175_vm12, %v178_v36, %v169_v33 }
 0x211   : > { %v186_v39 = vmul.f32 %v182_v37, %v179_v38 }
 0x213   : > { %187 = vadd.xlane.f32.xlu2 %v186_v39 }
 0x286   : > { %v188_v41 = vpop.xlane.xlu2 %187 }
 0x287   : > { %v189_v43 = vsel %vm185_vm13, %v188_v41, %v179_v38 }
 0x288   : > { %v196_v44 = vmul.f32 %v192_v42, %v189_v43 }
 0x28a   : > { %197 = vadd.xlane.f32.xlu2 %v196_v44 }
 0x2fd   : > { %v198_v46 = vpop.xlane.xlu2 %197 }
 0x2fe   : > { %v199_v48 = vsel %vm195_vm14, %v198_v46, %v189_v43 }
 0x2ff   : > { %v206_v49 = vmul.f32 %v202_v47, %v199_v48 }
 0x301   : > { %207 = vadd.xlane.f32.xlu0 %v206_v49 }
 0x374   : > { %v208_v51 = vpop.xlane.xlu0 %207 }
 0x375   : > { %v209_v53 = vsel %vm205_vm15, %v208_v51, %v199_v48 }
 0x376   : > { %v216_v54 = vmul.f32 %v212_v52, %v209_v53 }
 0x378   : > { %217 = vadd.xlane.f32.xlu1 %v216_v54 }
 0x3eb   : > { %v218_v55 = vpop.xlane.xlu1 %217 }
 0x3ec   : > { %v219_v56 = vsel %vm215_vm0, %v218_v55, %v209_v53 }
 0x3ed   : > { %v234_v57 = vmul.f32 %v219_v56, %v136_v17 }
 0x3ef   : > { %v236_v58 = vsel %vm128_vm5, %v219_v56, %v234_v57 }
 0x3f0   : > { %276 = vst [vmem:[%s246_s24] sm:$0xff] %v236_v58 }
 0x3f1 PF: > { %s7_s8 = sadd.s32 1, %s400_s8   ;;  %s480_s6 = smov %s396_s7 }
 0x3f2   : > { %p4_p5 = scmp.ge.s32.totalorder %s7_s8, 6   ;;  %s481_s7 = smov %s483_s10 }
 0x3f4   :  { %6 = sbr.rel (!%p4_p5) target bundleno = 2 (0x2), region = 125 }

// kernel: custom-call.40
= control target key start
LH: loop header
LB: loop body
LE: loop exit
PB: predicated region body
PF: predicated region fallthrough
CT: control target
= control target key end

     0   :  { %s412_s6 = smov 0   ;;  %s414_s7 = smov 0   ;;  %s477_s0 = inlined_call_operand.vmem [shape: f32[4,1,8,8], index: 0, kind: input, shape index: {}]   ;;  %s478_s1 = inlined_call_operand.vmem [shape: f32[4,1,8,8], index: 1, kind: output, shape index: {}]  }
   0x1   :  { %s416_s8 = smov 0  }
   0x2 LB: > { %s338_s9 = sadd.s32 4294967295, %s399_s8   ;;  %s33_s10 = sadd.s32 1, %s395_s7  ;;  %s399_s8 = sphi %s416_s8, %s7_s8   ;;  %s395_s7 = sphi %s414_s7, %s480_s7   ;;  %s391_s6 = sphi %s412_s6, %s479_s6  }
   0x3   : > { %p35_p0 = scmp.ge.s32.totalorder %s33_s10, 4  ;;  %p340_p1 = scmp.ge.s32.totalorder %s399_s8, 4 }
   0x4   : > { %s49_s11 = sand.u32 (!%p340_p1), 1, %s399_s8   ;;  %s342_s12 = sshll.u32 (!%p340_p1), %s395_s7, 3 }
   0x5   : > { %s482_s10 = smov (%p35_p0, %s33_s10), 0  ;;  %47 = sbr.rel (%p340_p1) target bundleno = 12 (0xc), region = 16 }
   0x6   : > { %s341_s13 = sshll.u32 (!%p340_p1), %s49_s11, 3  ;;  %s56_s16 = scalar_lea.vmem (!%p340_p1), %s477_s0, %s342_s12 }
   0x7   : > { %s51_s17 = scalar_lea.vmem (!%p340_p1), [#allocation0], %s341_s13 }
   0xa   : > { %v85_v0 = vld [vmem:[%s56_s16] sm:$0xff] }
   0xb   : > { %86 = vst [vmem:[%s51_s17] sm:$0xff] %v85_v0 }
   0xc PF: > { %p343_p2 = scmp.ge.s32.totalorder %s399_s8, 1  ;;  %p91_p3 = scmp.lt.s32.totalorder %s399_s8, 5 }
   0xe   : > { %p92_p4 = pnand %p343_p2, %p91_p3 }
  0x10   : > { %95 = sbr.rel (%p92_p4) target bundleno = 1009 (0x3f1), region = 54 }
  0x15   : > { %s98_s18 = sand.u32 1, %s338_s9   ;;  %v109_v1 = vlaneseq  ;;  %v401_v19 = vmov -1.0   ;;  %s347_s21 = sshll.u32 %s391_s6, 3 }
  0x16   : > { %s344_s19 = sshll.u32 %s98_s18, 3  ;;  %s245_s24 = scalar_lea.vmem %s478_s1, %s347_s21 }
  0x17   : > { %v439_v2 = vand.u32 127, %v109_v1  ;;  %v113_v3 = vshrl.u32 %v109_v1, 7  ;;  %s100_s20 = scalar_lea.vmem [#allocation0], %s344_s19 }
  0x18   : > { %v116_v4 = vld [vmem:[%s100_s20] sm:$0xff] }
  0x19   : > { %vm115_vm0 = vcmp.eq.s32.totalorder %v113_v3, %v439_v2  ;;  %vm111_vm1 = vcmp.lt.s32.totalorder %v439_v2, 8  ;;  %vm120_vm2 = vcmp.le.s32.totalorder %v113_v3, %v439_v2  ;;  %vm147_vm8 = vcmp.eq.s32.totalorder %v439_v2, 7 }
  0x1a   : > { %v117_v5 = vsel %vm115_vm0, %v116_v4, 0.0  ;;  %vm121_vm3 = vmand %vm120_vm2, %vm111_vm1  ;;  %vm144_vm9 = vcmp.eq.s32.totalorder %v439_v2, %v113_v3  ;;  %v148_v20 = vsel %vm147_vm8, 1.0, %v401_v19  ;;  %vm155_vm10 = vcmp.eq.s32.totalorder %v439_v2, 6 }
  0x1b   : > { %118 = vadd.xlane.f32.xlu0 %v117_v5  ;;  %v122_v14 = vsel %vm121_vm3, %v116_v4, 0.0  ;;  %v149_v21 = vsel %vm144_vm9, %v148_v20, 0.0  ;;  %vm165_vm11 = vcmp.eq.s32.totalorder %v439_v2, 5  ;;  %vm175_vm12 = vcmp.eq.s32.totalorder %v439_v2, 4 }
  0x1c   : > { %vm185_vm13 = vcmp.eq.s32.totalorder %v439_v2, 3  ;;  %vm195_vm14 = vcmp.eq.s32.totalorder %v439_v2, 2  ;;  %vm205_vm15 = vcmp.eq.s32.totalorder %v439_v2, 1  ;;  %vm214_vm0 = vcmp.eq.s32.totalorder %v439_v2, 0 }
  0x8e   : > { %v442_v6 = vpop.xlane.xlu0 %118 }
  0x8f   : > { %375 = vrcp.f32 %v442_v6  ;;  %v134_v10 = vand.u32 2147483648, %v442_v6  ;;  %v132_v12 = vand.u32 2147483647, %v442_v6  ;;  %vm128_vm5 = vweird.f32 %v442_v6 }
  0x91   : > { %v135_v15 = vor.u32 1.1754944e-38, %v134_v10  ;;  %vm133_vm7 = vcmp.eq.f32.partialorder %v132_v12, 8.507059e+37 }
  0x95   : > { %v376_v7 = vpop.eup %375 }
  0x96   : > { %v124_v8 = vmul.f32 %v376_v7, %v442_v6  ;;  %vm129_vm4 = vweird.f32 %v376_v7 }
  0x97   : > { %vm130_vm6 = vmor %vm128_vm5, %vm129_vm4 }
  0x98   : > { %v125_v9 = vsub.f32 1.0, %v124_v8 }
  0x9a   : > { %v126_v11 = vmul.f32 %v376_v7, %v125_v9 }
  0x9c   : > { %v127_v13 = vadd.f32 %v376_v7, %v126_v11 }
  0x9e   : > { %v131_v16 = vsel %vm130_vm6, %v376_v7, %v127_v13 }
  0x9f   : > { %v136_v17 = vsel %vm133_vm7, %v135_v15, %v131_v16 }
  0xa0   : > { %v137_v18 = vmul.f32 %v136_v17, %v122_v14 }
  0xa2   : > { %138 = vst [vmem:[#allocation2] sm:$0xff] %v137_v18 }
  0xa9   : > { %v151_v22 = vld [vmem:[#allocation2 + $0x6] ss:$0 sm:$0xff]  ;;  %v161_v25 = vld [vmem:[#allocation2 + $0x5] ss:$0 sm:$0xff]  ;;  %v171_v30 = vld [vmem:[#allocation2 + $0x4] ss:$0 sm:$0xff] }
  0xaa   : > { %v152_v23 = vxor.u32 2147483648, %v151_v22  ;;  %v162_v27 = vxor.u32 2147483648, %v161_v25  ;;  %v172_v32 = vxor.u32 2147483648, %v171_v30  ;;  %v181_v35 = vld [vmem:[#allocation2 + $0x3] ss:$0 sm:$0xff] }
  0xab   : > { %v182_v37 = vxor.u32 2147483648, %v181_v35  ;;  %v191_v40 = vld [vmem:[#allocation2 + $0x2] ss:$0 sm:$0xff]  ;;  %v201_v45 = vld [vmem:[#allocation2 + $0x1] ss:$0 sm:$0xff] }
  0xac   : > { %v156_v24 = vmul.f32 %v152_v23, %v149_v21  ;;  %v192_v42 = vxor.u32 2147483648, %v191_v40  ;;  %v202_v47 = vxor.u32 2147483648, %v201_v45  ;;  %v210_v50 = vld [vmem:[#allocation2] ss:$0 sm:$0xff] }
  0xad   : > { %v211_v52 = vxor.u32 2147483648, %v210_v50 }
  0xae   : > { %157 = vadd.xlane.f32.xlu0 %v156_v24 }
 0x121   : > { %v158_v26 = vpop.xlane.xlu0 %157 }
 0x122   : > { %v159_v28 = vsel %vm155_vm10, %v158_v26, %v149_v21 }
 0x123   : > { %v166_v29 = vmul.f32 %v162_v27, %v159_v28 }
 0x125   : > { %167 = vadd.xlane.f32.xlu1 %v166_v29 }
 0x198   : > { %v168_v31 = vpop.xlane.xlu1 %167 }
 0x199   : > { %v169_v33 = vsel %vm165_vm11, %v168_v31, %v159_v28 }
 0x19a   : > { %v176_v34 = vmul.f32 %v172_v32, %v169_v33 }
 0x19c   : > { %177 = vadd.xlane.f32.xlu1 %v176_v34 }
 0x20f   : > { %v178_v36 = vpop.xlane.xlu1 %177 }
 0x210   : > { %v179_v38 = vsel %vm175_vm12, %v178_v36, %v169_v33 }
 0x211   : > { %v186_v39 = vmul.f32 %v182_v37, %v179_v38 }
 0x213   : > { %187 = vadd.xlane.f32.xlu2 %v186_v39 }
 0x286   : > { %v188_v41 = vpop.xlane.xlu2 %187 }
 0x287   : > { %v189_v43 = vsel %vm185_vm13, %v188_v41, %v179_v38 }
 0x288   : > { %v196_v44 = vmul.f32 %v192_v42, %v189_v43 }
 0x28a   : > { %197 = vadd.xlane.f32.xlu2 %v196_v44 }
 0x2fd   : > { %v198_v46 = vpop.xlane.xlu2 %197 }
 0x2fe   : > { %v199_v48 = vsel %vm195_vm14, %v198_v46, %v189_v43 }
 0x2ff   : > { %v206_v49 = vmul.f32 %v202_v47, %v199_v48 }
 0x301   : > { %207 = vadd.xlane.f32.xlu0 %v206_v49 }
 0x374   : > { %v208_v51 = vpop.xlane.xlu0 %207 }
 0x375   : > { %v209_v53 = vsel %vm205_vm15, %v208_v51, %v199_v48 }
 0x376   : > { %v215_v54 = vmul.f32 %v211_v52, %v209_v53 }
 0x378   : > { %216 = vadd.xlane.f32.xlu1 %v215_v54 }
 0x3eb   : > { %v217_v55 = vpop.xlane.xlu1 %216 }
 0x3ec   : > { %v218_v56 = vsel %vm214_vm0, %v217_v55, %v209_v53 }
 0x3ed   : > { %v233_v57 = vmul.f32 %v218_v56, %v136_v17 }
 0x3ef   : > { %v235_v58 = vsel %vm128_vm5, %v218_v56, %v233_v57 }
 0x3f0   : > { %275 = vst [vmem:[%s245_s24] sm:$0xff] %v235_v58 }
 0x3f1 PF: > { %s7_s8 = sadd.s32 1, %s399_s8   ;;  %s479_s6 = smov %s395_s7 }
 0x3f2   : > { %p4_p5 = scmp.ge.s32.totalorder %s7_s8, 6   ;;  %s480_s7 = smov %s482_s10 }
 0x3f4   :  { %6 = sbr.rel (!%p4_p5) target bundleno = 2 (0x2), region = 124 }

// kernel: body.7
= control target key start
LH: loop header
LB: loop body
LE: loop exit
PB: predicated region body
PF: predicated region fallthrough
CT: control target
= control target key end

     0   :  { %11 = vsyncpa [#allocation3], 0  ;;  %vm34_vm0 = vcmask 1040384   ;;  %s331_s0 = inlined_call_operand.vmem [shape: f32[64,73], index: 0, kind: input, shape index: {}]   ;;  %s332_s1 = inlined_call_operand.vmem [shape: f32[73,64], index: 1, kind: input, shape index: {}]   ;;  %s333_s2 = inlined_call_operand.vmem [shape: f32[4,73], index: 2, kind: input, shape index: {}]   ;;  %s334_s3 = inlined_call_operand.hbm [shape: f32[4,64], index: 3, kind: output, shape index: {0}]   ;;  %s335_s4 = inlined_call_operand.hbm [shape: f32[1,64], index: 4, kind: output, shape index: {1}]   ;;  %s336_s5 = inlined_call_operand.vmem [shape: f32[4,73], index: 5, kind: output, shape index: {2}]  }
   0x1   :  { %v29_v0 = vld [vmem:[%s332_s1 + $0x48] sm:$0x1]  ;;  %v28_v1 = vld [vmem:[%s332_s1 + $0x40] sm:$0xff]  ;;  %v27_v2 = vld [vmem:[%s332_s1 + $0x38] sm:$0xff] }
   0x2   :  { %167 = vmatpush.msk.msra.mxu0 %vm34_vm0, %v29_v0 }
   0x4   :  { %45 = vmatpush.msra.mxu0 %v28_v1 }
   0x5   :  { %12 = vsyncpa [#allocation5], 0  ;;  %v26_v3 = vld [vmem:[%s332_s1 + $0x30] sm:$0xff]  ;;  %v25_v4 = vld [vmem:[%s332_s1 + $0x28] sm:$0xff]  ;;  %vm30_vm1 = vcmask 596992   ;;  %vm58_vm2 = vcmask 519168  }
   0x6   :  { %46 = vmatpush.msra.mxu0 %v27_v2  ;;  %v24_v5 = vld [vmem:[%s332_s1 + $0x20] sm:$0xff]  ;;  %v23_v6 = vld [vmem:[%s332_s1 + $0x18] sm:$0xff]  ;;  %v22_v7 = vld [vmem:[%s332_s1 + $0x10] sm:$0xff]  ;;  %vm80_vm3 = vcmask 516096   ;;  %s138_s7 = sshll.u32 %s334_s3, 4  ;;  %vm93_vm4 = vcmask 523264   ;;  %s139_s7 = int_to_ptr.hbm [resolvable:$true] %s138_s7 }
   0x7   :  { %v21_v8 = vld [vmem:[%s332_s1 + $0x8] sm:$0xff]  ;;  %v20_v9 = vld [vmem:[%s332_s1] sm:$0xff]  ;;  %v92_v19 = vld [vmem:[%s331_s0 + $0x38] sm:$0xff]  ;;  %s231_s8 = smov [#allocation4]   ;;  %s149_s12 = sshll.u32 %s335_s4, 4  ;;  %vm121_vm5 = vcmask 592896   ;;  %s150_s12 = int_to_ptr.hbm [resolvable:$true] %s149_s12 }
   0x8   :  { %47 = vmatpush.msra.mxu0 %v26_v3  ;;  %v19_v10 = vld [vmem:[%s333_s2] sm:$0xf]  ;;  %105 = vmatpush.msra.mxu1 %v92_v19  ;;  %v91_v21 = vld [vmem:[%s331_s0 + $0x30] sm:$0xff]  ;;  %v90_v23 = vld [vmem:[%s331_s0 + $0x28] sm:$0xff]  ;;  %s147_s9 = sshll.u32 %s231_s8, 4  ;;  %s148_s9 = int_to_ptr.vmem [resolvable:$true] %s147_s9 }
   0x9   :  { %v89_v24 = vld [vmem:[%s331_s0 + $0x20] sm:$0xff]  ;;  %v88_v25 = vld [vmem:[%s331_s0 + $0x18] sm:$0xff]  ;;  %v87_v26 = vld [vmem:[%s331_s0 + $0x10] sm:$0xff] }
   0xa   :  { %48 = vmatpush.msra.mxu0 %v25_v4  ;;  %106 = vmatpush.msra.mxu1 %v91_v21  ;;  %v86_v27 = vld [vmem:[%s331_s0 + $0x8] sm:$0xff]  ;;  %v85_v29 = vld [vmem:[%s331_s0] sm:$0xff]  ;;  %s230_s0 = smov [#allocation2]  }
   0xb   :  { %s136_s29 = sshll.u32 %s230_s0, 4  ;;  %s137_s29 = int_to_ptr.vmem [resolvable:$true] %s136_s29 }
   0xc   :  { %49 = vmatpush.msra.mxu0 %v24_v5  ;;  %107 = vmatpush.msra.mxu1 %v90_v23 }
   0xe   :  { %50 = vmatpush.msra.mxu0 %v23_v6  ;;  %108 = vmatpush.msra.mxu1 %v89_v24 }
  0x10   :  { %51 = vmatpush.msra.mxu0 %v22_v7  ;;  %109 = vmatpush.msra.mxu1 %v88_v25 }
  0x12   :  { %52 = vmatpush.msra.mxu0 %v21_v8  ;;  %110 = vmatpush.msra.mxu1 %v87_v26 }
  0x14   :  { %53 = vmatpush.msra.mxu0 %v20_v9  ;;  %111 = vmatpush.msra.mxu1 %v86_v27 }
  0x15   :  { %168 = vmatmul.msk.f32.vlgmr.msra.gmra.mxu0 %vm30_vm1, %v19_v10 }
  0x16   :  { %112 = vmatpush.msra.mxu1 %v85_v29 }
  0x92   :  { %v55_v11 = vpop.f32.mrf.mxu0 }
  0x93   :  { %v60_v12 = vsel %vm58_vm2, %v55_v11, -inf  ;;  %59 = vst.msk [vmem:[#allocation2] sm:$0xf] %vm58_vm2, %v55_v11 }
  0x94   :  { %v61_v13 = vrot.slane %v60_v12, 4  ;;  %141 = dma.vmem_to_hbm [thread:$0]  %s137_s29, 64, %s139_s7, [#allocation3]  }
  0x96   :  { %v62_v14 = vmax.f32 %v60_v12, %v61_v13 }
  0x98   :  { %v63_v15 = vrot.slane %v62_v14, 2 }
  0x9a   :  { %v64_v16 = vmax.f32 %v62_v14, %v63_v15 }
  0x9c   :  { %v65_v17 = vrot.slane %v64_v16, 1 }
  0x9e   :  { %v66_v18 = vmax.f32 %v64_v16, %v65_v17 }
  0xa0   :  { %v67_v20 = vsub.f32 %v55_v11, %v66_v18 }
  0xa2   :  { %v68_v22 = vmul.f32 1.442695, %v67_v20 }
  0xa4   :  { %172 = vpow2.f32 %v68_v22 }
  0xaa   :  { %v173_v28 = vpop.eup %172 }
  0xab   :  { %v70_v30 = vsel %vm58_vm2, %v173_v28, 0.0 }
  0xac   :  { %v71_v31 = vrot.slane %v70_v30, 4 }
  0xae   :  { %v72_v32 = vadd.f32 %v71_v31, %v70_v30 }
  0xb0   :  { %v73_v33 = vrot.slane %v72_v32, 2 }
  0xb2   :  { %v74_v34 = vadd.f32 %v73_v33, %v72_v32 }
  0xb4   :  { %v75_v35 = vrot.slane %v74_v34, 1 }
  0xb6   :  { %v76_v36 = vadd.f32 %v75_v35, %v74_v34 }
  0xb8   :  { %174 = vlog2.f32 %v76_v36 }
  0xbe   :  { %v175_v37 = vpop.eup %174 }
  0xbf   :  { %v78_v38 = vmul.f32 0.6931472, %v175_v37 }
  0xc1   :  { %v79_v39 = vadd.f32 %v78_v38, %v66_v18 }
  0xc3   :  { %v82_v40 = vsub.f32 %v55_v11, %v79_v39  ;;  %81 = vst.msk [vmem:[#allocation4] sm:$0x1] %vm80_vm3, %v79_v39 }
  0xc4   :  { %152 = dma.vmem_to_hbm [thread:$0]  %s148_s9, 16, %s150_s12, [#allocation5]  }
  0xc5   :  { %v83_v41 = vmul.f32 1.442695, %v82_v40 }
  0xc7   :  { %176 = vpow2.f32 %v83_v41 }
  0xcd   :  { %v177_v42 = vpop.eup %176 }
  0xce   :  { %169 = vmatmul.msk.f32.vlgmr.msra.gmra.mxu1 %vm93_vm4, %v177_v42 }
 0x14b   :  { %v114_v43 = vpop.f32.mrf.mxu1 }
 0x14c   :  { %122 = vst.msk [vmem:[%s336_s5] sm:$0xf] %vm121_vm5, %v114_v43 }
 0x14d   :  { %226 = dma.done.wait [#allocation3], 64  }
 0x14e   :  { %227 = vsyncadd [#allocation3], 4294967232 }
 0x14f   :  { %228 = dma.done.wait [#allocation5], 16  }
 0x150   :  { %229 = vsyncadd [#allocation5], 4294967280 }
 0x151   :  { %165 = vsyncpa [#allocation3], 1 }
 0x152   :  { %166 = vsyncpa [#allocation5], 1 }

</bundles_post_ra>
